<compile_context>
chip_gen: v7x
topology: tpu7x:2x2x1
jax: 0.10.0
libtpu: 0.0.40
codegen_flags: <defaults>
</compile_context>

<pallas_src>
import functools

import jax
import jax.numpy as jnp
from jax.experimental import pallas as pl
from jax.experimental.pallas import tpu as pltpu

EPS = 1e-5
NEG_SLOPE = 0.1     # module uses F.leaky_relu(..., negative_slope=0.1)
LANE = 128
SUBLANE = 8


def _ceil_to(a, b):
    return -(-a // b) * b


def _leaky_relu(x):
    return jnp.where(x >= 0, x, NEG_SLOPE * x)


def _bn_normalize(h):
    """Training-mode BatchNorm1d WITHOUT affine (gamma/beta folded into the
    next Linear on the host).  One-pass moments + fused scale/shift:
        mean = sum(h)/B ; var = sum(h*h)/B - mean^2   (biased variance)
        out  = h * rsqrt(var+eps) + (-mean * rsqrt(var+eps))
    Zero-padded lanes stay exactly zero (mean=0, shift=0)."""
    inv_b = 1.0 / h.shape[0]
    s = jnp.sum(h, axis=0, keepdims=True)
    sq = jnp.sum(h * h, axis=0, keepdims=True)
    mean = s * inv_b
    var = sq * inv_b - mean * mean
    scale = jax.lax.rsqrt(var + EPS)          # EUP slot, effectively free
    shift = -mean * scale
    return h * scale + shift


# --------------------------------------------------------------------------
# Slab layout (pure-Python, shared by host packing and kernel slicing)
# --------------------------------------------------------------------------
def _slab_layout(layer_dims):
    """layer_dims = (state_size, fc1, fc2, fc3, action_size)."""
    S, fc1, fc2, fc3, A = layer_dims
    s_rows = _ceil_to(S, SUBLANE)
    P1, P2, P3, P4 = (_ceil_to(d, LANE) for d in (fc1, fc2, fc3, A))
    lanes = max(P1, P2, P3, P4)
    row_counts = (s_rows, P1, P2, P3, SUBLANE)   # w1, w2, w3, w4, bias block
    offsets, r = [], 0
    for rc in row_counts:
        offsets.append(r)
        r += rc
    return tuple(offsets), (P1, P2, P3, P4), s_rows, lanes, r


# --------------------------------------------------------------------------
# Host-side fold + pack.  Call ONCE per parameter update (not per forward).
# --------------------------------------------------------------------------
def pack_params(params, *, weight_dtype=jnp.bfloat16):
    """Fold BN_i affine into Linear_{i+1}, lane-pad narrow dims to 128, and
    sublane-concatenate all weights + biases into ONE (rows, 128) slab."""
    layer_dims = (params["w1"].shape[0], params["w1"].shape[1],
                  params["w2"].shape[1], params["w3"].shape[1],
                  params["w4"].shape[1])
    offsets, (P1, P2, P3, P4), s_rows, lanes, total_rows = _slab_layout(layer_dims)

    # z @ W + b with z = g*n + be  ==  n @ (g[:,None]*W) + (b + be @ W)
    w1 = params["w1"]
    b1 = params["b1"]
    w2 = params["g1"][0][:, None] * params["w2"]
    b2 = params["b2"] + params["be1"] @ params["w2"]
    w3 = params["g2"][0][:, None] * params["w3"]
    b3 = params["b3"] + params["be2"] @ params["w3"]
    w4 = params["g3"][0][:, None] * params["w4"]
    b4 = params["b4"] + params["be3"] @ params["w4"]

    def pad_block(w, rows):
        return jnp.pad(w, ((0, rows - w.shape[0]), (0, lanes - w.shape[1])))

    slab = jnp.zeros((total_rows, lanes), jnp.float32)
    for off, blk in ((offsets[0], pad_block(w1, s_rows)),
                     (offsets[1], pad_block(w2, P1)),
                     (offsets[2], pad_block(w3, P2)),
                     (offsets[3], pad_block(w4, P3))):
        slab = slab.at[off:off + blk.shape[0], :].set(blk)

    bias_rows = jnp.zeros((SUBLANE, lanes), jnp.float32)
    for r, b in enumerate((b1, b2, b3, b4)):
        bias_rows = bias_rows.at[r, : b.shape[1]].set(b[0])
    slab = slab.at[offsets[4]:offsets[4] + SUBLANE, :].set(bias_rows)

    return slab.astype(weight_dtype)


# --------------------------------------------------------------------------
# Kernel
# --------------------------------------------------------------------------
def qnetwork_kernel(x_ref, p_ref, out_ref, *, offsets, padded_dims, state_rows):
    o1, o2, o3, o4, ob = offsets
    P1, P2, P3, P4 = padded_dims
    S = state_rows
    mm = p_ref.dtype            # matmul operand dtype (bf16 default, or f32)
    f32 = jnp.float32

    # One aligned load of the bias block; row slices are in-vreg selects.
    bias = p_ref[ob:ob + SUBLANE, :].astype(f32)
    b1 = bias[0:1, :P1]
    b2 = bias[1:2, :P2]
    b3 = bias[2:3, :P3]
    b4 = bias[3:4, :P4]

    # fc1 -> leaky_relu -> bn1 (affine folded into fc2)
    h = jnp.dot(x_ref[...].astype(mm), p_ref[o1:o1 + S, :P1],
                preferred_element_type=f32) + b1
    h = _bn_normalize(_leaky_relu(h))

    # fc2' -> leaky_relu -> bn2 (affine folded into fc3)
    h = jnp.dot(h.astype(mm), p_ref[o2:o2 + P1, :P2],
                preferred_element_type=f32) + b2
    h = _bn_normalize(_leaky_relu(h))

    # fc3' -> leaky_relu -> bn3 (affine folded into fc4); lanes 64..127 stay 0
    h = jnp.dot(h.astype(mm), p_ref[o3:o3 + P2, :P3],
                preferred_element_type=f32) + b3
    h = _bn_normalize(_leaky_relu(h))

    # fc4' head; full (B, 128) lane-dense unmasked store
    out = jnp.dot(h.astype(mm), p_ref[o4:o4 + P3, :P4],
                  preferred_element_type=f32) + b4
    out_ref[...] = out.astype(out_ref.dtype)


# --------------------------------------------------------------------------
# Wrapper (per-call path: one pallas_call + one lane slice)
# --------------------------------------------------------------------------
def qnetwork_forward(x, slab, *, layer_dims):
    """x: (B, state_size) f32.  slab: prefolded/packed params (pack_params)."""
    S, fc1, fc2, fc3, A = layer_dims
    offsets, padded, s_rows, lanes, total_rows = _slab_layout(layer_dims)
    assert slab.shape == (total_rows, lanes), "slab does not match layer_dims"
    B = x.shape[0]
    if x.shape[1] != s_rows:                      # static no-op when aligned
        x = jnp.pad(x, ((0, 0), (0, s_rows - x.shape[1])))

    kernel = functools.partial(
        qnetwork_kernel, offsets=offsets, padded_dims=padded, state_rows=s_rows)
    vmem = pl.BlockSpec(memory_space=pltpu.MemorySpace.VMEM)

    out_padded = pl.pallas_call(
        kernel,
        out_shape=jax.ShapeDtypeStruct((B, padded[3]), jnp.float32),
        in_specs=[vmem, vmem],
        out_specs=vmem,
    )(x, slab)
    return out_padded[:, :A]


# --------------------------------------------------------------------------
# Synthetic init + plain-JAX reference (module semantics, unfolded params)
# --------------------------------------------------------------------------
def init_params(key, state_size, action_size, fc1_units=128, fc2_units=128,
                fc3_units=64):
    """Linear weights stored pre-transposed as (in_features, out_features).
    BN gamma/beta randomized (PyTorch defaults are 1/0) so host folding is
    actually exercised."""
    dims = [(state_size, fc1_units), (fc1_units, fc2_units),
            (fc2_units, fc3_units), (fc3_units, action_size)]
    params = {}
    for i, (fan_in, fan_out) in enumerate(dims, start=1):
        key, kw, kb = jax.random.split(key, 3)
        bound = 1.0 / (fan_in ** 0.5)
        params[f"w{i}"] = jax.random.uniform(
            kw, (fan_in, fan_out), jnp.float32, -bound, bound)
        params[f"b{i}"] = jax.random.uniform(
            kb, (1, fan_out), jnp.float32, -bound, bound)
    for i, units in enumerate([fc1_units, fc2_units, fc3_units], start=1):
        key, kg, kbe = jax.random.split(key, 3)
        params[f"g{i}"] = 1.0 + 0.1 * jax.random.normal(kg, (1, units), jnp.float32)
        params[f"be{i}"] = 0.1 * jax.random.normal(kbe, (1, units), jnp.float32)
    return params


def _batchnorm_ref(x, gamma, beta):
    mean = jnp.mean(x, axis=0, keepdims=True)
    var = jnp.mean((x - mean) * (x - mean), axis=0, keepdims=True)
    return (x - mean) * jax.lax.rsqrt(var + EPS) * gamma + beta


def reference_forward(x, params):
    h = x
    for i in range(1, 4):
        h = h @ params[f"w{i}"] + params[f"b{i}"]
        h = _leaky_relu(h)
        h = _batchnorm_ref(h, params[f"g{i}"], params[f"be{i}"])
    return h @ params["w4"] + params["b4"]


if __name__ == "__main__":
    B, STATE_SIZE, ACTION_SIZE = 8, 16, 4
    FC1, FC2, FC3 = 128, 128, 64
    layer_dims = (STATE_SIZE, FC1, FC2, FC3, ACTION_SIZE)

    key = jax.random.PRNGKey(0)
    key, kx, kp = jax.random.split(key, 3)
    x = jax.random.normal(kx, (B, STATE_SIZE), jnp.float32)
    params = init_params(kp, STATE_SIZE, ACTION_SIZE, FC1, FC2, FC3)

    ref = reference_forward(x, params)

    fwd = jax.jit(functools.partial(qnetwork_forward, layer_dims=layer_dims))

    # f32 weights: tight check of kernel + BN folding against unfolded reference.
    slab_f32 = pack_params(params, weight_dtype=jnp.float32)
    out_f32 = jax.block_until_ready(fwd(x, slab_f32))
    assert out_f32.shape == (B, ACTION_SIZE)
    assert jnp.allclose(out_f32, ref, atol=1e-3, rtol=1e-3), "f32 mismatch vs reference"

    # bf16 weights (default perf config): looser tolerance (weights rounded to bf16).
    slab_bf16 = pack_params(params)          # weight_dtype defaults to bf16
    out_bf16 = jax.block_until_ready(fwd(x, slab_bf16))
    assert out_bf16.shape == (B, ACTION_SIZE)
    assert jnp.allclose(out_bf16, ref, atol=5e-2, rtol=5e-2), "bf16 mismatch vs reference"

    print("KERNEL_OK")
</pallas_src>

<mosaic_0001>
module attributes {stable_mosaic.version = 11 : i64} {
  func.func @qnetwork_kernel(%arg0: memref<8x16xf32, #tpu.memory_space<vmem>>, %arg1: memref<408x128xf32, #tpu.memory_space<vmem>>, %arg2: memref<8x128xf32, #tpu.memory_space<vmem>>) attributes {dimension_semantics = [], scalar_prefetch = 0 : i64, scratch_operands = 0 : i64, tpu.core_type = #tpu.core_type<tc>} {
    %c400 = arith.constant 400 : index
    %c0 = arith.constant 0 : index
    %0 = vector.load %arg1[%c400, %c0] : memref<408x128xf32, #tpu.memory_space<vmem>>, vector<8x128xf32>
    %1 = vector.extract_strided_slice %0 {offsets = [0, 0], sizes = [1, 128], strides = [1, 1]} : vector<8x128xf32> to vector<1x128xf32>
    %2 = vector.extract_strided_slice %0 {offsets = [1, 0], sizes = [1, 128], strides = [1, 1]} : vector<8x128xf32> to vector<1x128xf32>
    %3 = vector.extract_strided_slice %0 {offsets = [2, 0], sizes = [1, 128], strides = [1, 1]} : vector<8x128xf32> to vector<1x128xf32>
    %4 = vector.extract_strided_slice %0 {offsets = [3, 0], sizes = [1, 128], strides = [1, 1]} : vector<8x128xf32> to vector<1x128xf32>
    %c0_0 = arith.constant 0 : index
    %c0_1 = arith.constant 0 : index
    %5 = vector.load %arg0[%c0_0, %c0_1] : memref<8x16xf32, #tpu.memory_space<vmem>>, vector<8x16xf32>
    %c0_2 = arith.constant 0 : index
    %c0_3 = arith.constant 0 : index
    %6 = vector.load %arg1[%c0_2, %c0_3] : memref<408x128xf32, #tpu.memory_space<vmem>>, vector<16x128xf32>
    %cst = arith.constant dense<0.000000e+00> : vector<8x128xf32>
    %7 = tpu.matmul %5, %6, %cst {dimension_numbers = #tpu.dot_dimension_numbers<[1], [0], [0], [1], [0, 0, 1, 1], [], []>} : vector<8x16xf32>, vector<16x128xf32>, vector<8x128xf32> -> vector<8x128xf32>
    %8 = vector.broadcast %1 : vector<1x128xf32> to vector<8x128xf32>
    %9 = arith.addf %7, %8 : vector<8x128xf32>
    %cst_4 = arith.constant 0.000000e+00 : f32
    %10 = vector.broadcast %cst_4 : f32 to vector<8x128xf32>
    %11 = arith.cmpf oge, %9, %10 : vector<8x128xf32>
    %cst_5 = arith.constant 1.000000e-01 : f32
    %12 = vector.broadcast %cst_5 : f32 to vector<8x128xf32>
    %13 = arith.mulf %12, %9 : vector<8x128xf32>
    %14 = arith.select %11, %9, %13 : vector<8x128xi1>, vector<8x128xf32>
    %cst_6 = arith.constant dense<0.000000e+00> : vector<128xf32>
    %15 = vector.multi_reduction <add>, %14, %cst_6 [0] : vector<8x128xf32> to vector<128xf32>
    %16 = vector.shape_cast %15 : vector<128xf32> to vector<1x128xf32>
    %17 = arith.mulf %14, %14 : vector<8x128xf32>
    %cst_7 = arith.constant dense<0.000000e+00> : vector<128xf32>
    %18 = vector.multi_reduction <add>, %17, %cst_7 [0] : vector<8x128xf32> to vector<128xf32>
    %19 = vector.shape_cast %18 : vector<128xf32> to vector<1x128xf32>
    %cst_8 = arith.constant 1.250000e-01 : f32
    %20 = vector.broadcast %cst_8 : f32 to vector<1x128xf32>
    %21 = arith.mulf %16, %20 : vector<1x128xf32>
    %cst_9 = arith.constant 1.250000e-01 : f32
    %22 = vector.broadcast %cst_9 : f32 to vector<1x128xf32>
    %23 = arith.mulf %19, %22 : vector<1x128xf32>
    %24 = arith.mulf %21, %21 : vector<1x128xf32>
    %25 = arith.subf %23, %24 : vector<1x128xf32>
    %cst_10 = arith.constant 9.99999974E-6 : f32
    %26 = vector.broadcast %cst_10 : f32 to vector<1x128xf32>
    %27 = arith.addf %25, %26 : vector<1x128xf32>
    %28 = math.rsqrt %27 : vector<1x128xf32>
    %cst_11 = arith.constant 0.000000e+00 : f32
    %29 = vector.broadcast %cst_11 : f32 to vector<1x128xf32>
    %30 = arith.subf %29, %21 : vector<1x128xf32>
    %31 = arith.mulf %30, %28 : vector<1x128xf32>
    %32 = vector.broadcast %28 : vector<1x128xf32> to vector<8x128xf32>
    %33 = arith.mulf %14, %32 : vector<8x128xf32>
    %34 = vector.broadcast %31 : vector<1x128xf32> to vector<8x128xf32>
    %35 = arith.addf %33, %34 : vector<8x128xf32>
    %c16 = arith.constant 16 : index
    %c0_12 = arith.constant 0 : index
    %36 = vector.load %arg1[%c16, %c0_12] : memref<408x128xf32, #tpu.memory_space<vmem>>, vector<128x128xf32>
    %cst_13 = arith.constant dense<0.000000e+00> : vector<8x128xf32>
    %37 = tpu.matmul %35, %36, %cst_13 {dimension_numbers = #tpu.dot_dimension_numbers<[1], [0], [0], [1], [0, 0, 1, 1], [], []>} : vector<8x128xf32>, vector<128x128xf32>, vector<8x128xf32> -> vector<8x128xf32>
    %38 = vector.broadcast %2 : vector<1x128xf32> to vector<8x128xf32>
    %39 = arith.addf %37, %38 : vector<8x128xf32>
    %cst_14 = arith.constant 0.000000e+00 : f32
    %40 = vector.broadcast %cst_14 : f32 to vector<8x128xf32>
    %41 = arith.cmpf oge, %39, %40 : vector<8x128xf32>
    %cst_15 = arith.constant 1.000000e-01 : f32
    %42 = vector.broadcast %cst_15 : f32 to vector<8x128xf32>
    %43 = arith.mulf %42, %39 : vector<8x128xf32>
    %44 = arith.select %41, %39, %43 : vector<8x128xi1>, vector<8x128xf32>
    %cst_16 = arith.constant dense<0.000000e+00> : vector<128xf32>
    %45 = vector.multi_reduction <add>, %44, %cst_16 [0] : vector<8x128xf32> to vector<128xf32>
    %46 = vector.shape_cast %45 : vector<128xf32> to vector<1x128xf32>
    %47 = arith.mulf %44, %44 : vector<8x128xf32>
    %cst_17 = arith.constant dense<0.000000e+00> : vector<128xf32>
    %48 = vector.multi_reduction <add>, %47, %cst_17 [0] : vector<8x128xf32> to vector<128xf32>
    %49 = vector.shape_cast %48 : vector<128xf32> to vector<1x128xf32>
    %cst_18 = arith.constant 1.250000e-01 : f32
    %50 = vector.broadcast %cst_18 : f32 to vector<1x128xf32>
    %51 = arith.mulf %46, %50 : vector<1x128xf32>
    %cst_19 = arith.constant 1.250000e-01 : f32
    %52 = vector.broadcast %cst_19 : f32 to vector<1x128xf32>
    %53 = arith.mulf %49, %52 : vector<1x128xf32>
    %54 = arith.mulf %51, %51 : vector<1x128xf32>
    %55 = arith.subf %53, %54 : vector<1x128xf32>
    %cst_20 = arith.constant 9.99999974E-6 : f32
    %56 = vector.broadcast %cst_20 : f32 to vector<1x128xf32>
    %57 = arith.addf %55, %56 : vector<1x128xf32>
    %58 = math.rsqrt %57 : vector<1x128xf32>
    %cst_21 = arith.constant 0.000000e+00 : f32
    %59 = vector.broadcast %cst_21 : f32 to vector<1x128xf32>
    %60 = arith.subf %59, %51 : vector<1x128xf32>
    %61 = arith.mulf %60, %58 : vector<1x128xf32>
    %62 = vector.broadcast %58 : vector<1x128xf32> to vector<8x128xf32>
    %63 = arith.mulf %44, %62 : vector<8x128xf32>
    %64 = vector.broadcast %61 : vector<1x128xf32> to vector<8x128xf32>
    %65 = arith.addf %63, %64 : vector<8x128xf32>
    %c144 = arith.constant 144 : index
    %c0_22 = arith.constant 0 : index
    %66 = vector.load %arg1[%c144, %c0_22] : memref<408x128xf32, #tpu.memory_space<vmem>>, vector<128x128xf32>
    %cst_23 = arith.constant dense<0.000000e+00> : vector<8x128xf32>
    %67 = tpu.matmul %65, %66, %cst_23 {dimension_numbers = #tpu.dot_dimension_numbers<[1], [0], [0], [1], [0, 0, 1, 1], [], []>} : vector<8x128xf32>, vector<128x128xf32>, vector<8x128xf32> -> vector<8x128xf32>
    %68 = vector.broadcast %3 : vector<1x128xf32> to vector<8x128xf32>
    %69 = arith.addf %67, %68 : vector<8x128xf32>
    %cst_24 = arith.constant 0.000000e+00 : f32
    %70 = vector.broadcast %cst_24 : f32 to vector<8x128xf32>
    %71 = arith.cmpf oge, %69, %70 : vector<8x128xf32>
    %cst_25 = arith.constant 1.000000e-01 : f32
    %72 = vector.broadcast %cst_25 : f32 to vector<8x128xf32>
    %73 = arith.mulf %72, %69 : vector<8x128xf32>
    %74 = arith.select %71, %69, %73 : vector<8x128xi1>, vector<8x128xf32>
    %cst_26 = arith.constant dense<0.000000e+00> : vector<128xf32>
    %75 = vector.multi_reduction <add>, %74, %cst_26 [0] : vector<8x128xf32> to vector<128xf32>
    %76 = vector.shape_cast %75 : vector<128xf32> to vector<1x128xf32>
    %77 = arith.mulf %74, %74 : vector<8x128xf32>
    %cst_27 = arith.constant dense<0.000000e+00> : vector<128xf32>
    %78 = vector.multi_reduction <add>, %77, %cst_27 [0] : vector<8x128xf32> to vector<128xf32>
    %79 = vector.shape_cast %78 : vector<128xf32> to vector<1x128xf32>
    %cst_28 = arith.constant 1.250000e-01 : f32
    %80 = vector.broadcast %cst_28 : f32 to vector<1x128xf32>
    %81 = arith.mulf %76, %80 : vector<1x128xf32>
    %cst_29 = arith.constant 1.250000e-01 : f32
    %82 = vector.broadcast %cst_29 : f32 to vector<1x128xf32>
    %83 = arith.mulf %79, %82 : vector<1x128xf32>
    %84 = arith.mulf %81, %81 : vector<1x128xf32>
    %85 = arith.subf %83, %84 : vector<1x128xf32>
    %cst_30 = arith.constant 9.99999974E-6 : f32
    %86 = vector.broadcast %cst_30 : f32 to vector<1x128xf32>
    %87 = arith.addf %85, %86 : vector<1x128xf32>
    %88 = math.rsqrt %87 : vector<1x128xf32>
    %cst_31 = arith.constant 0.000000e+00 : f32
    %89 = vector.broadcast %cst_31 : f32 to vector<1x128xf32>
    %90 = arith.subf %89, %81 : vector<1x128xf32>
    %91 = arith.mulf %90, %88 : vector<1x128xf32>
    %92 = vector.broadcast %88 : vector<1x128xf32> to vector<8x128xf32>
    %93 = arith.mulf %74, %92 : vector<8x128xf32>
    %94 = vector.broadcast %91 : vector<1x128xf32> to vector<8x128xf32>
    %95 = arith.addf %93, %94 : vector<8x128xf32>
    %c272 = arith.constant 272 : index
    %c0_32 = arith.constant 0 : index
    %96 = vector.load %arg1[%c272, %c0_32] : memref<408x128xf32, #tpu.memory_space<vmem>>, vector<128x128xf32>
    %cst_33 = arith.constant dense<0.000000e+00> : vector<8x128xf32>
    %97 = tpu.matmul %95, %96, %cst_33 {dimension_numbers = #tpu.dot_dimension_numbers<[1], [0], [0], [1], [0, 0, 1, 1], [], []>} : vector<8x128xf32>, vector<128x128xf32>, vector<8x128xf32> -> vector<8x128xf32>
    %98 = vector.broadcast %4 : vector<1x128xf32> to vector<8x128xf32>
    %99 = arith.addf %97, %98 : vector<8x128xf32>
    %c0_34 = arith.constant 0 : index
    %c0_35 = arith.constant 0 : index
    %100 = vector.load %arg2[%c0_34, %c0_35] : memref<8x128xf32, #tpu.memory_space<vmem>>, vector<8x128xf32>
    tpu.vector_store %arg2[%c0_34, %c0_35], %99 {strides = array<i32>} : memref<8x128xf32, #tpu.memory_space<vmem>>, vector<8x128xf32>,
    return
  }
}

</mosaic_0001>

<bundles_post_ra>
// kernel: qnetwork_forward.1
= control target key start
LH: loop header
LB: loop body
LE: loop exit
PB: predicated region body
PF: predicated region fallthrough
CT: control target
= control target key end

     0   :  { %7 = vsyncpa [#allocation3], 0  ;;  %s878_s0 = inlined_call_operand.hbm [shape: f32[8,16], index: 0, kind: input, shape index: {}]   ;;  %s879_s1 = inlined_call_operand.hbm [shape: f32[408,128], index: 1, kind: input, shape index: {}]   ;;  %s880_s2 = inlined_call_operand.vmem [shape: f32[8,128], index: 2, kind: output, shape index: {}]  }
   0x1   :  { %8 = vsyncpa [#allocation5], 0  ;;  %s777_s9 = smov [#allocation2]   ;;  %s778_s11 = smov [#allocation4]  }
   0x2   :  { %s15_s10 = sshll.u32 %s777_s9, 4  ;;  %s24_s12 = sshll.u32 %s778_s11, 4  ;;  %s16_s10 = int_to_ptr.vmem [resolvable:$true] %s15_s10  ;;  %s799_s12 = int_to_ptr.vmem [resolvable:$true] %s24_s12 }
   0x3   :  { %s729_s15 = scalar_lea.hbm %s878_s0, 128 }
   0x4   :  { %p730_p0 = scmp.ne.s32.totalorder %s878_s0, %s729_s15  ;;  %p733_p1 = scmp.lt.u32.totalorder %s729_s15, %s878_s0 }
   0x6   :  { %p735_p2 = pnand %p733_p1, %p730_p0 }
   0x8   :  { %738 = shalt.err (!%p735_p2)
}
   0x9   :  { %s739_s20 = scalar_lea.vmem %s16_s10, 128  ;;  %p744_p4 = scmp.lt.s32.totalorder %s16_s10, %s16_s10 }
   0xa   :  { %p740_p3 = scmp.ne.s32.totalorder %s16_s10, %s739_s20  ;;  %p745_p5 = scmp.lt.s32.totalorder %s739_s20, %s739_s20 }
   0xc   :  { %p746_p6 = por %p745_p5, %p744_p4 }
   0xe   :  { %p747_p7 = pnand %p746_p6, %p740_p3 }
  0x10   :  { %750 = shalt.err (!%p747_p7)
}
  0x11   :  { %18 = dma.hbm_to_vmem [thread:$0]  %s878_s0, 128, %s16_s10, [#allocation3]  }
  0x12   :  { %s751_s25 = scalar_lea.hbm %s879_s1, 6528 }
  0x13   :  { %p752_p8 = scmp.ne.s32.totalorder %s879_s1, %s751_s25  ;;  %p755_p9 = scmp.lt.u32.totalorder %s751_s25, %s879_s1 }
  0x15   :  { %p757_p10 = pnand %p755_p9, %p752_p8 }
  0x17   :  { %760 = shalt.err (!%p757_p10)
}
  0x18   :  { %s761_s30 = scalar_lea.vmem %s799_s12, 6528  ;;  %p766_p12 = scmp.lt.s32.totalorder %s799_s12, %s799_s12 }
  0x19   :  { %p762_p11 = scmp.ne.s32.totalorder %s799_s12, %s761_s30  ;;  %p767_p13 = scmp.lt.s32.totalorder %s761_s30, %s761_s30 }
  0x1b   :  { %p768_p0 = por %p767_p13, %p766_p12 }
  0x1d   :  { %p769_p1 = pnand %p768_p0, %p762_p11 }
  0x1f   :  { %772 = shalt.err (!%p769_p1)
}
  0x20   :  { %s779_s0 = smov 128   ;;  %s780_s3 = smov 8  }
  0x21   :  { %30 = dma.hbm_to_vmem [thread:$0]  %s879_s1, 6528, %s799_s12, [#allocation5], %s779_s0, %s779_s0, %s780_s3  }
  0x22   :  { %773 = dma.done.wait [#allocation3], 128  }
  0x23   :  { %774 = vsyncadd [#allocation3], 4294967168 }
  0x24   :  { %775 = dma.done.wait [#allocation5], 6528  }
  0x25   :  { %776 = vsyncadd [#allocation5], 4294960768  ;;  %v781_v0 = vmov 0.0|0.0   ;;  %vm782_vm0 = vmmov 0   ;;  %v783_v1 = vmov 0.0   ;;  %v39_v2 = vld [vmem:[#allocation4] sm:$0xff]  ;;  %v41_v30 = vlaneseq }
  0x26   :  { %641 = vmatprep.subr.bf16.mxu0 %v781_v0  ;;  %533 = vmatprep.mubr.msk.f32.mxu0 %vm782_vm0, %v783_v1  ;;  %v40_v3 = vld [vmem:[#allocation4 + $0x8] sm:$0xff]  ;;  %v38_v5 = vld [vmem:[#allocation2] sm:$0xff]  ;;  %vm45_vm1 = vcmask 130048   ;;  %v145_v6 = vld [vmem:[#allocation4 + $0x10] sm:$0xff] }
  0x27   :  { %644 = vmatprep.subr.bf16.mxu1 %v781_v0  ;;  %568 = vmatprep.mubr.msk.f32.mxu1 %vm782_vm0, %v783_v1  ;;  %v642_v4 = vpack.c.bf16 %v40_v3, %v39_v2  ;;  %v146_v7 = vld [vmem:[#allocation4 + $0x18] sm:$0xff]  ;;  %v147_v9 = vld [vmem:[#allocation4 + $0x20] sm:$0xff]  ;;  %v148_v10 = vld [vmem:[#allocation4 + $0x28] sm:$0xff]  ;;  %v847_v31 = vshrl.u32 %v41_v30, 7 }
  0x28   :  { %v645_v8 = vpack.c.bf16 %v146_v7, %v145_v6  ;;  %v648_v11 = vpack.c.bf16 %v148_v10, %v147_v9  ;;  %v149_v12 = vld [vmem:[#allocation4 + $0x30] sm:$0xff]  ;;  %v150_v13 = vld [vmem:[#allocation4 + $0x38] sm:$0xff]  ;;  %v151_v15 = vld [vmem:[#allocation4 + $0x40] sm:$0xff] }
  0x29   :  { %643 = vmatpush3.bf16.msra.mxu0 %v642_v4  ;;  %v651_v14 = vpack.c.bf16 %v150_v13, %v149_v12  ;;  %v152_v16 = vld [vmem:[#allocation4 + $0x48] sm:$0xff]  ;;  %v153_v18 = vld [vmem:[#allocation4 + $0x50] sm:$0xff]  ;;  %v154_v19 = vld [vmem:[#allocation4 + $0x58] sm:$0xff]  ;;  %v43_v32 = vsub.s32 0, %v847_v31 }
  0x2a   :  { %668 = vmatprep.subr.bf16.mxu0 %v781_v0  ;;  %646 = vmatpush3.bf16.msra.mxu1 %v645_v8  ;;  %v654_v17 = vpack.c.bf16 %v152_v16, %v151_v15  ;;  %v657_v20 = vpack.c.bf16 %v154_v19, %v153_v18  ;;  %v155_v21 = vld [vmem:[#allocation4 + $0x60] sm:$0xff]  ;;  %v156_v22 = vld [vmem:[#allocation4 + $0x68] sm:$0xff]  ;;  %v157_v24 = vld [vmem:[#allocation4 + $0x70] sm:$0xff] }
  0x2b   :  { %647 = vmatprep.subr.bf16.mxu1 %v781_v0  ;;  %v660_v23 = vpack.c.bf16 %v156_v22, %v155_v21  ;;  %v158_v25 = vld [vmem:[#allocation4 + $0x78] sm:$0xff]  ;;  %v159_v27 = vld [vmem:[#allocation4 + $0x80] sm:$0xff]  ;;  %v160_v28 = vld [vmem:[#allocation4 + $0x88] sm:$0xff] }
  0x2c   :  { %534 = vmatmul.mubr.msk.f32.vlgmr.msra.gmra.mrb[0].mxu0 %vm45_vm1, %v38_v5  ;;  %v663_v26 = vpack.c.bf16 %v158_v25, %v157_v24  ;;  %v666_v29 = vpack.c.bf16 %v160_v28, %v159_v27  ;;  %v850_v33 = vld [vmem:[#allocation4 + $0x190] sm:$0xff]  ;;  %v262_v2 = vld [vmem:[#allocation4 + $0x98] sm:$0xff]  ;;  %v263_v4 = vld [vmem:[#allocation4 + $0xa0] sm:$0xff]  ;;  %v163_v24 = vsub.s32 1, %v847_v31 }
  0x2d   :  { %603 = vmatprep.mubr.msk.f32.mxu0 %vm782_vm0, %v783_v1  ;;  %v44_v34 = vrot.slane %v850_v33, %v43_v32  ;;  %v261_v63 = vld [vmem:[#allocation4 + $0x90] sm:$0xff]  ;;  %v264_v5 = vld [vmem:[#allocation4 + $0xa8] sm:$0xff]  ;;  %v266_v8 = vld [vmem:[#allocation4 + $0xb8] sm:$0xff] }
  0x2e   :  { %649 = vmatpush3.bf16.msra.mxu1 %v648_v11  ;;  %v669_v3 = vpack.c.bf16 %v262_v2, %v261_v63  ;;  %v672_v6 = vpack.c.bf16 %v264_v5, %v263_v4  ;;  %v265_v7 = vld [vmem:[#allocation4 + $0xb0] sm:$0xff]  ;;  %v267_v10 = vld [vmem:[#allocation4 + $0xc0] sm:$0xff]  ;;  %v270_v13 = vld [vmem:[#allocation4 + $0xd8] sm:$0xff]  ;;  %v164_v25 = vrot.slane %v850_v33, %v163_v24 }
  0x2f   :  { %650 = vmatprep.subr.bf16.mxu1 %v781_v0  ;;  %v675_v9 = vpack.c.bf16 %v266_v8, %v265_v7  ;;  %v269_v12 = vld [vmem:[#allocation4 + $0xd0] sm:$0xff]  ;;  %v271_v15 = vld [vmem:[#allocation4 + $0xe0] sm:$0xff]  ;;  %v272_v16 = vld [vmem:[#allocation4 + $0xe8] sm:$0xff] }
  0x30   :  { %670 = vmatpush3.bf16.msra.mxu0 %v669_v3  ;;  %v273_v18 = vld [vmem:[#allocation4 + $0xf0] sm:$0xff]  ;;  %v274_v19 = vld [vmem:[#allocation4 + $0xf8] sm:$0xff]  ;;  %v275_v21 = vld [vmem:[#allocation4 + $0x100] sm:$0xff] }
  0x31   :  { %671 = vmatprep.subr.bf16.mxu0 %v781_v0  ;;  %v276_v22 = vld [vmem:[#allocation4 + $0x108] sm:$0xff]  ;;  %v382_v63 = vld [vmem:[#allocation4 + $0x138] sm:$0xff]  ;;  %v383_v3 = vld [vmem:[#allocation4 + $0x140] sm:$0xff] }
  0x32   :  { %652 = vmatpush3.bf16.msra.mxu1 %v651_v14  ;;  %v681_v14 = vpack.c.bf16 %v270_v13, %v269_v12  ;;  %v384_v4 = vld [vmem:[#allocation4 + $0x148] sm:$0xff]  ;;  %v386_v7 = vld [vmem:[#allocation4 + $0x158] sm:$0xff] }
  0x33   :  { %653 = vmatprep.subr.bf16.mxu1 %v781_v0  ;;  %v702_v5 = vpack.c.bf16 %v384_v4, %v383_v3  ;;  %v390_v12 = vld [vmem:[#allocation4 + $0x178] sm:$0xff] }
  0x34   :  { %673 = vmatpush3.bf16.msra.mxu0 %v672_v6  ;;  %v385_v6 = vld [vmem:[#allocation4 + $0x150] sm:$0xff] }
  0x35   :  { %674 = vmatprep.subr.bf16.mxu0 %v781_v0  ;;  %v705_v8 = vpack.c.bf16 %v386_v7, %v385_v6 }
  0x36   :  { %655 = vmatpush3.bf16.msra.mxu1 %v654_v17  ;;  %v684_v17 = vpack.c.bf16 %v272_v16, %v271_v15  ;;  %v392_v15 = vld [vmem:[#allocation4 + $0x188] sm:$0xff] }
  0x37   :  { %656 = vmatprep.subr.bf16.mxu1 %v781_v0 }
  0x38   :  { %676 = vmatpush3.bf16.msra.mxu0 %v675_v9  ;;  %v387_v9 = vld [vmem:[#allocation4 + $0x160] sm:$0xff] }
  0x39   :  { %677 = vmatprep.subr.bf16.mxu0 %v781_v0 }
  0x3a   :  { %658 = vmatpush3.bf16.msra.mxu1 %v657_v20  ;;  %v687_v20 = vpack.c.bf16 %v274_v19, %v273_v18 }
  0x3b   :  { %659 = vmatprep.subr.bf16.mxu1 %v781_v0 }
  0x3e   :  { %661 = vmatpush3.bf16.msra.mxu1 %v660_v23  ;;  %v690_v23 = vpack.c.bf16 %v276_v22, %v275_v21 }
  0x3f   :  { %662 = vmatprep.subr.bf16.mxu1 %v781_v0 }
  0x42   :  { %664 = vmatpush3.bf16.msra.mxu1 %v663_v26 }
  0x43   :  { %665 = vmatprep.subr.bf16.mxu1 %v781_v0 }
  0x46   :  { %667 = vmatpush3.bf16.msra.mxu1 %v666_v29 }
  0x47   :  { %692 = vmatprep.subr.bf16.mxu1 %v781_v0 }
  0xff   :  { %v115_v35 = vpop.f32.mrb[0].mxu0 }
 0x100   :  { %v116_v36 = vadd.f32 %v115_v35, %v44_v34  ;;  %v535_v37 = vpop.f32.mrb[1].mxu0 }
 0x102   :  { %vm119_vm2 = vcmp.ge.f32.partialorder %v116_v36, 0.0  ;;  %v120_v38 = vmul.f32 0.1, %v116_v36 }
 0x104   :  { %v121_v39 = vsel %vm119_vm2, %v116_v36, %v120_v38 }
 0x105   :  { %v122_v40 = vrot.slane %v121_v39, 4  ;;  %v128_v41 = vmul.f32 %v121_v39, %v121_v39 }
 0x107   :  { %v123_v42 = vadd.f32 %v122_v40, %v121_v39  ;;  %v129_v43 = vrot.slane %v128_v41, 4 }
 0x109   :  { %v124_v44 = vrot.slane %v123_v42, 2  ;;  %v130_v45 = vadd.f32 %v129_v43, %v128_v41 }
 0x10b   :  { %v125_v46 = vadd.f32 %v124_v44, %v123_v42  ;;  %v131_v47 = vrot.slane %v130_v45, 2 }
 0x10d   :  { %v132_v48 = vadd.f32 %v131_v47, %v130_v45  ;;  %v126_v49 = vrot.slane %v125_v46, 1 }
 0x10f   :  { %v133_v50 = vrot.slane %v132_v48, 1  ;;  %v127_v51 = vadd.f32 %v126_v49, %v125_v46 }
 0x111   :  { %v134_v52 = vadd.f32 %v133_v50, %v132_v48  ;;  %v135_v53 = vmul.f32 0.125, %v127_v51 }
 0x113   :  { %v136_v54 = vmul.f32 0.125, %v134_v52  ;;  %v137_v55 = vmul.f32 %v135_v53, %v135_v53  ;;  %v141_v58 = vsub.f32 0.0, %v135_v53 }
 0x115   :  { %v138_v56 = vsub.f32 %v136_v54, %v137_v55 }
 0x117   :  { %v139_v57 = vadd.f32 1e-05, %v138_v56  ;;  %v377_v56 = vld [vmem:[#allocation4 + $0x110] sm:$0xff] }
 0x119   :  { %723 = vrsqrt.f32 %v139_v57  ;;  %v378_v57 = vld [vmem:[#allocation4 + $0x118] sm:$0xff] }
 0x123   :  { %v724_v59 = vpop.eup %723 }
 0x124   :  { %v142_v60 = vmul.f32 %v724_v59, %v141_v58  ;;  %v143_v61 = vmul.f32 %v724_v59, %v121_v39  ;;  %v693_v58 = vpack.c.bf16 %v378_v57, %v377_v56  ;;  %v379_v59 = vld [vmem:[#allocation4 + $0x120] sm:$0xff] }
 0x126   :  { %v144_v62 = vadd.f32 %v143_v61, %v142_v60  ;;  %v380_v60 = vld [vmem:[#allocation4 + $0x128] sm:$0xff] }
 0x127   :  { %v696_v61 = vpack.c.bf16 %v380_v60, %v379_v59 }
 0x128   :  { %569 = vmatmul.mubr.f32.vlgmr.msra.gmra.mrb[0].mxu1 %v144_v62  ;;  %v381_v62 = vld [vmem:[#allocation4 + $0x130] sm:$0xff] }
 0x129   :  { %638 = vmatprep.mubr.msk.f32.mxu1 %vm782_vm0, %v783_v1  ;;  %v268_v1 = vld [vmem:[#allocation4 + $0xc8] sm:$0xff]  ;;  %694 = vmatpush3.bf16.msra.mxu1 %v693_v58  ;;  %v699_v2 = vpack.c.bf16 %v382_v63, %v381_v62 }
 0x12a   :  { %v678_v11 = vpack.c.bf16 %v268_v1, %v267_v10  ;;  %695 = vmatprep.subr.bf16.mxu1 %v781_v0  ;;  %v388_v10 = vld [vmem:[#allocation4 + $0x168] sm:$0xff] }
 0x12b   :  { %v708_v1 = vpack.c.bf16 %v388_v10, %v387_v9 }
 0x12c   :  { %679 = vmatpush3.bf16.msra.mxu0 %v678_v11  ;;  %v389_v11 = vld [vmem:[#allocation4 + $0x170] sm:$0xff] }
 0x12d   :  { %680 = vmatprep.subr.bf16.mxu0 %v781_v0  ;;  %697 = vmatpush3.bf16.msra.mxu1 %v696_v61  ;;  %v711_v13 = vpack.c.bf16 %v390_v12, %v389_v11 }
 0x12e   :  { %698 = vmatprep.subr.bf16.mxu1 %v781_v0 }
 0x130   :  { %682 = vmatpush3.bf16.msra.mxu0 %v681_v14  ;;  %v391_v14 = vld [vmem:[#allocation4 + $0x180] sm:$0xff] }
 0x131   :  { %683 = vmatprep.subr.bf16.mxu0 %v781_v0  ;;  %700 = vmatpush3.bf16.msra.mxu1 %v699_v2  ;;  %v714_v16 = vpack.c.bf16 %v392_v15, %v391_v14 }
 0x132   :  { %701 = vmatprep.subr.bf16.mxu1 %v781_v0 }
 0x134   :  { %685 = vmatpush3.bf16.msra.mxu0 %v684_v17  ;;  %v279_v17 = vsub.s32 2, %v847_v31 }
 0x135   :  { %686 = vmatprep.subr.bf16.mxu0 %v781_v0  ;;  %703 = vmatpush3.bf16.msra.mxu1 %v702_v5 }
 0x136   :  { %704 = vmatprep.subr.bf16.mxu1 %v781_v0  ;;  %v280_v18 = vrot.slane %v850_v33, %v279_v17 }
 0x138   :  { %688 = vmatpush3.bf16.msra.mxu0 %v687_v20 }
 0x139   :  { %689 = vmatprep.subr.bf16.mxu0 %v781_v0  ;;  %706 = vmatpush3.bf16.msra.mxu1 %v705_v8 }
 0x13a   :  { %707 = vmatprep.subr.bf16.mxu1 %v781_v0 }
 0x13c   :  { %691 = vmatpush3.bf16.msra.mxu0 %v690_v23 }
 0x13d   :  { %709 = vmatpush3.bf16.msra.mxu1 %v708_v1 }
 0x13e   :  { %710 = vmatprep.subr.bf16.mxu1 %v781_v0 }
 0x141   :  { %712 = vmatpush3.bf16.msra.mxu1 %v711_v13 }
 0x142   :  { %713 = vmatprep.subr.bf16.mxu1 %v781_v0 }
 0x145   :  { %715 = vmatpush3.bf16.msra.mxu1 %v714_v16 }
 0x1fb   :  { %v231_v26 = vpop.f32.mrb[0].mxu1 }
 0x1fc   :  { %v232_v27 = vadd.f32 %v231_v26, %v164_v25  ;;  %v570_v28 = vpop.f32.mrb[1].mxu1 }
 0x1fe   :  { %vm235_vm3 = vcmp.ge.f32.partialorder %v232_v27, 0.0  ;;  %v236_v29 = vmul.f32 0.1, %v232_v27 }
 0x200   :  { %v237_v30 = vsel %vm235_vm3, %v232_v27, %v236_v29 }
 0x201   :  { %v238_v32 = vrot.slane %v237_v30, 4  ;;  %v244_v34 = vmul.f32 %v237_v30, %v237_v30 }
 0x203   :  { %v239_v35 = vadd.f32 %v238_v32, %v237_v30  ;;  %v245_v36 = vrot.slane %v244_v34, 4 }
 0x205   :  { %v240_v37 = vrot.slane %v239_v35, 2  ;;  %v246_v38 = vadd.f32 %v245_v36, %v244_v34 }
 0x207   :  { %v241_v39 = vadd.f32 %v240_v37, %v239_v35  ;;  %v247_v40 = vrot.slane %v246_v38, 2 }
 0x209   :  { %v242_v41 = vrot.slane %v241_v39, 1  ;;  %v248_v42 = vadd.f32 %v247_v40, %v246_v38 }
 0x20b   :  { %v243_v43 = vadd.f32 %v242_v41, %v241_v39  ;;  %v249_v44 = vrot.slane %v248_v42, 1 }
 0x20d   :  { %v250_v45 = vadd.f32 %v249_v44, %v248_v42  ;;  %v251_v46 = vmul.f32 0.125, %v243_v43 }
 0x20f   :  { %v252_v47 = vmul.f32 0.125, %v250_v45  ;;  %v253_v48 = vmul.f32 %v251_v46, %v251_v46  ;;  %v257_v51 = vsub.f32 0.0, %v251_v46 }
 0x211   :  { %v254_v49 = vsub.f32 %v252_v47, %v253_v48  ;;  %v395_v48 = vsub.s32 3, %v847_v31 }
 0x213   :  { %v255_v50 = vadd.f32 1e-05, %v254_v49  ;;  %v396_v49 = vrot.slane %v850_v33, %v395_v48 }
 0x215   :  { %725 = vrsqrt.f32 %v255_v50 }
 0x21f   :  { %v726_v52 = vpop.eup %725 }
 0x220   :  { %v259_v53 = vmul.f32 %v726_v52, %v237_v30  ;;  %v258_v54 = vmul.f32 %v726_v52, %v257_v51 }
 0x222   :  { %v260_v55 = vadd.f32 %v259_v53, %v258_v54 }
 0x224   :  { %604 = vmatmul.mubr.f32.vlgmr.msra.gmra.mrb[2].mxu0 %v260_v55 }
 0x2f7   :  { %v347_v19 = vpop.f32.mrb[2].mxu0 }
 0x2f8   :  { %v348_v20 = vadd.f32 %v347_v19, %v280_v18  ;;  %v605_v21 = vpop.f32.mrb[3].mxu0 }
 0x2fa   :  { %vm351_vm4 = vcmp.ge.f32.partialorder %v348_v20, 0.0  ;;  %v352_v22 = vmul.f32 0.1, %v348_v20 }
 0x2fc   :  { %v353_v23 = vsel %vm351_vm4, %v348_v20, %v352_v22 }
 0x2fd   :  { %v354_v24 = vrot.slane %v353_v23, 4  ;;  %v360_v25 = vmul.f32 %v353_v23, %v353_v23 }
 0x2ff   :  { %v355_v26 = vadd.f32 %v354_v24, %v353_v23  ;;  %v361_v27 = vrot.slane %v360_v25, 4 }
 0x301   :  { %v356_v28 = vrot.slane %v355_v26, 2  ;;  %v362_v0 = vadd.f32 %v361_v27, %v360_v25 }
 0x303   :  { %v357_v29 = vadd.f32 %v356_v28, %v355_v26  ;;  %v363_v30 = vrot.slane %v362_v0, 2 }
 0x305   :  { %v358_v32 = vrot.slane %v357_v29, 1  ;;  %v364_v34 = vadd.f32 %v363_v30, %v362_v0 }
 0x307   :  { %v359_v35 = vadd.f32 %v358_v32, %v357_v29  ;;  %v365_v36 = vrot.slane %v364_v34, 1 }
 0x309   :  { %v366_v37 = vadd.f32 %v365_v36, %v364_v34  ;;  %v367_v38 = vmul.f32 0.125, %v359_v35 }
 0x30b   :  { %v368_v39 = vmul.f32 0.125, %v366_v37  ;;  %v369_v40 = vmul.f32 %v367_v38, %v367_v38  ;;  %v373_v43 = vsub.f32 0.0, %v367_v38 }
 0x30d   :  { %v370_v41 = vsub.f32 %v368_v39, %v369_v40 }
 0x30f   :  { %v371_v42 = vadd.f32 1e-05, %v370_v41 }
 0x311   :  { %727 = vrsqrt.f32 %v371_v42 }
 0x31b   :  { %v728_v44 = vpop.eup %727 }
 0x31c   :  { %v375_v45 = vmul.f32 %v728_v44, %v353_v23  ;;  %v374_v46 = vmul.f32 %v728_v44, %v373_v43 }
 0x31e   :  { %v376_v47 = vadd.f32 %v375_v45, %v374_v46 }
 0x320   :  { %639 = vmatmul.mubr.f32.vlgmr.msra.gmra.mrb[2].mxu1 %v376_v47 }
 0x3f3   :  { %v463_v50 = vpop.f32.mrb[2].mxu1 }
 0x3f4   :  { %v464_v51 = vadd.f32 %v463_v50, %v396_v49  ;;  %v640_v52 = vpop.f32.mrb[3].mxu1 }
 0x3f6   :  { %467 = vst [vmem:[%s880_s2] sm:$0xff] %v464_v51 }
 0x3f7   :  { %472 = vsyncpa [#allocation3], 1 }
 0x3f8   :  { %473 = vsyncpa [#allocation5], 1 }

</bundles_post_ra>
